<compile_context>
chip_gen: v7x
topology: tpu7x:2x2x1
jax: 0.10.0
libtpu: 0.0.40
codegen_flags: <defaults>
</compile_context>

<pallas_src>
import jax
import jax.numpy as jnp
from jax.experimental import pallas as pl
from jax.experimental.pallas import tpu as pltpu

EPS = 1e-5  # nn.LayerNorm default

# Conservative budgets that work on every generation:
#   v7x: 64 MiB VMEM/TC, v5e/v6e: 128 MiB. 48 MiB scoped limit leaves headroom on v7x.
_VMEM_LIMIT_BYTES = 48 * 1024 * 1024
# Double-buffered input + double-buffered output = 4 resident (rt, D) tiles.
_TILE_BUDGET_BYTES = 36 * 1024 * 1024


def layernorm_kernel(x_ref, gamma_ref, beta_ref, o_ref):
    # Native-dtype DMA; widen to f32 only inside the kernel (halves HBM reads for bf16).
    x = x_ref[...].astype(jnp.float32)                  # (rt, D)
    mean = jnp.mean(x, axis=-1, keepdims=True)          # (rt, 1)
    xc = x - mean
    var = jnp.mean(xc * xc, axis=-1, keepdims=True)     # biased variance (PyTorch semantics)
    inv = jax.lax.rsqrt(var + EPS)                      # EUP rsqrt
    gamma = gamma_ref[...].astype(jnp.float32)          # (1, D)
    beta = beta_ref[...].astype(jnp.float32)            # (1, D)
    o_ref[...] = ((xc * inv) * gamma + beta).astype(o_ref.dtype)


def _round_up(n, m):
    return ((n + m - 1) // m) * m


def _select_row_tile(rows, d_model, itemsize):
    # Sublane packing: 8 rows for 4-byte dtypes, 16 for bf16, 32 for int8/fp8.
    pack = max(8, 32 // max(int(itemsize), 1))
    # 4 resident tiles (2x-buffered in + out), each rt * D * itemsize bytes.
    bytes_per_row = 4 * d_model * int(itemsize)
    rt = _TILE_BUDGET_BYTES // max(bytes_per_row, 1)
    rt = max(pack, (rt // pack) * pack)
    rt = min(rt, 1024)                       # diminishing returns past ~1024 rows
    rt = min(rt, _round_up(rows, pack))      # never tile wider than the (padded) input
    return rt


def layer_normalization(x, gamma, beta):
    """x: (..., d_model); gamma/beta: (d_model,). Normalizes over the last axis."""
    orig_shape = x.shape
    d_model = orig_shape[-1]
    rows = 1
    for s in orig_shape[:-1]:
        rows *= s

    x2 = x.reshape(rows, d_model)
    gamma2 = gamma.reshape(1, d_model)
    beta2 = beta.reshape(1, d_model)

    rt = _select_row_tile(rows, d_model, jnp.dtype(x.dtype).itemsize)

    # cdiv grid + zero-padded tail tile (padded rows normalize to `beta`, then dropped).
    num_tiles = pl.cdiv(rows, rt)
    rows_padded = num_tiles * rt
    if rows_padded != rows:
        x2 = jnp.pad(x2, ((0, rows_padded - rows), (0, 0)))

    # Note: for d_model < 128 only part of each lane group is active; correct but
    # lane-underutilized. Production d_model >= 128 hits the lane-dense fast path.
    out = pl.pallas_call(
        layernorm_kernel,
        out_shape=jax.ShapeDtypeStruct((rows_padded, d_model), x.dtype),
        grid_spec=pltpu.PrefetchScalarGridSpec(
            num_scalar_prefetch=0,
            grid=(num_tiles,),
            in_specs=[
                pl.BlockSpec((rt, d_model), lambda i: (i, 0)),
                pl.BlockSpec((1, d_model), lambda i: (0, 0)),
                pl.BlockSpec((1, d_model), lambda i: (0, 0)),
            ],
            out_specs=pl.BlockSpec((rt, d_model), lambda i: (i, 0)),
        ),
        compiler_params=pltpu.CompilerParams(
            dimension_semantics=("parallel",),
            vmem_limit_bytes=_VMEM_LIMIT_BYTES,
        ),
    )(x2, gamma2, beta2)

    if rows_padded != rows:
        out = out[:rows]
    return out.reshape(orig_shape)


def _reference(x, gamma, beta):
    mean = jnp.mean(x, axis=-1, keepdims=True)
    var = jnp.mean((x - mean) ** 2, axis=-1, keepdims=True)
    return (x - mean) / jnp.sqrt(var + EPS) * gamma + beta


if __name__ == "__main__":
    key = jax.random.PRNGKey(0)

    # Primary case: small but lane-dense (d_model multiple of 128).
    batch, seq, d_model = 2, 8, 128
    x = jax.random.normal(key, (batch, seq, d_model), dtype=jnp.float32)
    # nn.LayerNorm(d_model) default init: weight=ones, bias=zeros
    gamma = jnp.ones((d_model,), dtype=jnp.float32)
    beta = jnp.zeros((d_model,), dtype=jnp.float32)

    y = layer_normalization(x, gamma, beta)
    y = jax.block_until_ready(y)
    assert jnp.allclose(y, _reference(x, gamma, beta), atol=1e-5, rtol=1e-5), \
        "mismatch vs reference (dense case)"

    # Ragged row count: exercises the cdiv grid + padded tail tile path.
    x2 = jax.random.normal(jax.random.PRNGKey(1), (3, 5, d_model), dtype=jnp.float32)
    y2 = jax.block_until_ready(layer_normalization(x2, gamma, beta))
    assert jnp.allclose(y2, _reference(x2, gamma, beta), atol=1e-5, rtol=1e-5), \
        "mismatch vs reference (ragged case)"

    print("KERNEL_OK")
</pallas_src>

<mosaic_0001>
module attributes {stable_mosaic.version = 11 : i64} {
  func.func @layernorm_kernel(%arg0: i32, %arg1: memref<16x128xf32, #tpu.memory_space<vmem>>, %arg2: memref<1x128xf32, #tpu.memory_space<vmem>>, %arg3: memref<1x128xf32, #tpu.memory_space<vmem>>, %arg4: memref<16x128xf32, #tpu.memory_space<vmem>>) attributes {dimension_semantics = [#tpu.dimension_semantics<parallel>], iteration_bounds = array<i64: 1>, scalar_prefetch = 0 : i64, scratch_operands = 0 : i64, tpu.core_type = #tpu.core_type<tc>, window_params = [{transform_indices = @transform_0, window_bounds = array<i64: 16, 128>}, {pipeline_mode = #tpu.pipeline_mode<synchronous>, transform_indices = @transform_1, window_bounds = array<i64: 1, 128>}, {pipeline_mode = #tpu.pipeline_mode<synchronous>, transform_indices = @transform_2, window_bounds = array<i64: 1, 128>}, {transform_indices = @transform_3, window_bounds = array<i64: 16, 128>}]} {
    %c0 = arith.constant 0 : index
    %c0_0 = arith.constant 0 : index
    %0 = vector.load %arg1[%c0, %c0_0] : memref<16x128xf32, #tpu.memory_space<vmem>>, vector<16x128xf32>
    %cst = arith.constant dense<0.000000e+00> : vector<16xf32>
    %1 = vector.multi_reduction <add>, %0, %cst [1] : vector<16x128xf32> to vector<16xf32>
    %2 = vector.shape_cast %1 : vector<16xf32> to vector<16x1xf32>
    %cst_1 = arith.constant 1.280000e+02 : f32
    %3 = vector.broadcast %cst_1 : f32 to vector<16x1xf32>
    %4 = arith.divf %2, %3 : vector<16x1xf32>
    %5 = vector.broadcast %4 : vector<16x1xf32> to vector<16x128xf32>
    %6 = arith.subf %0, %5 : vector<16x128xf32>
    %7 = arith.mulf %6, %6 : vector<16x128xf32>
    %cst_2 = arith.constant dense<0.000000e+00> : vector<16xf32>
    %8 = vector.multi_reduction <add>, %7, %cst_2 [1] : vector<16x128xf32> to vector<16xf32>
    %9 = vector.shape_cast %8 : vector<16xf32> to vector<16x1xf32>
    %cst_3 = arith.constant 1.280000e+02 : f32
    %10 = vector.broadcast %cst_3 : f32 to vector<16x1xf32>
    %11 = arith.divf %9, %10 : vector<16x1xf32>
    %cst_4 = arith.constant 9.99999974E-6 : f32
    %12 = vector.broadcast %cst_4 : f32 to vector<16x1xf32>
    %13 = arith.addf %11, %12 : vector<16x1xf32>
    %14 = math.rsqrt %13 : vector<16x1xf32>
    %c0_5 = arith.constant 0 : index
    %c0_6 = arith.constant 0 : index
    %15 = vector.load %arg2[%c0_5, %c0_6] : memref<1x128xf32, #tpu.memory_space<vmem>>, vector<1x128xf32>
    %c0_7 = arith.constant 0 : index
    %c0_8 = arith.constant 0 : index
    %16 = vector.load %arg3[%c0_7, %c0_8] : memref<1x128xf32, #tpu.memory_space<vmem>>, vector<1x128xf32>
    %17 = vector.broadcast %14 : vector<16x1xf32> to vector<16x128xf32>
    %18 = arith.mulf %6, %17 : vector<16x128xf32>
    %19 = vector.broadcast %15 : vector<1x128xf32> to vector<16x128xf32>
    %20 = arith.mulf %18, %19 : vector<16x128xf32>
    %21 = vector.broadcast %16 : vector<1x128xf32> to vector<16x128xf32>
    %22 = arith.addf %20, %21 : vector<16x128xf32>
    %c0_9 = arith.constant 0 : index
    %c0_10 = arith.constant 0 : index
    %23 = vector.load %arg4[%c0_9, %c0_10] : memref<16x128xf32, #tpu.memory_space<vmem>>, vector<16x128xf32>
    tpu.vector_store %arg4[%c0_9, %c0_10], %22 {strides = array<i32>} : memref<16x128xf32, #tpu.memory_space<vmem>>, vector<16x128xf32>,
    return
  }
  func.func @transform_0(%arg0: i32) -> (i32, i32) {
    %c0_i32 = arith.constant 0 : i32
    %c0_i32_0 = arith.constant 0 : i32
    return %arg0, %c0_i32 : i32, i32
  }
  func.func @transform_1(%arg0: i32) -> (i32, i32) {
    %c0_i32 = arith.constant 0 : i32
    %c0_i32_0 = arith.constant 0 : i32
    %c0_i32_1 = arith.constant 0 : i32
    return %c0_i32, %c0_i32_0 : i32, i32
  }
  func.func @transform_2(%arg0: i32) -> (i32, i32) {
    %c0_i32 = arith.constant 0 : i32
    %c0_i32_0 = arith.constant 0 : i32
    %c0_i32_1 = arith.constant 0 : i32
    return %c0_i32, %c0_i32_0 : i32, i32
  }
  func.func @transform_3(%arg0: i32) -> (i32, i32) {
    %c0_i32 = arith.constant 0 : i32
    %c0_i32_0 = arith.constant 0 : i32
    return %arg0, %c0_i32 : i32, i32
  }
}

</mosaic_0001>

<bundles_post_ra>
// kernel: tpu_custom_call.1
= control target key start
LH: loop header
LB: loop body
LE: loop exit
PB: predicated region body
PF: predicated region fallthrough
CT: control target
= control target key end

     0   :  { %8 = vsyncpa [#allocation3], 0  ;;  %s209_s0 = inlined_call_operand.hbm [shape: f32[16,128], index: 0, kind: input, shape index: {}]   ;;  %s210_s1 = inlined_call_operand.vmem [shape: f32[1,128], index: 1, kind: input, shape index: {}]   ;;  %s211_s2 = inlined_call_operand.vmem [shape: f32[1,128], index: 2, kind: input, shape index: {}]   ;;  %s212_s3 = inlined_call_operand.hbm [shape: f32[16,128], index: 3, kind: output, shape index: {}]  }
   0x1   :  { %9 = vsyncpa [#allocation4], 0  ;;  %s149_s12 = smov [#allocation2]   ;;  %s101_s16 = scalar_lea.hbm %s209_s0, 256 }
   0x2   :  { %s15_s13 = sshll.u32 %s149_s12, 4  ;;  %p102_p0 = scmp.ne.s32.totalorder %s209_s0, %s101_s16  ;;  %s16_s13 = int_to_ptr.vmem [resolvable:$true] %s15_s13 }
   0x3   :  { %p105_p1 = scmp.lt.u32.totalorder %s101_s16, %s209_s0 }
   0x5   :  { %p107_p2 = pnand %p105_p1, %p102_p0 }
   0x7   :  { %110 = shalt.err (!%p107_p2)
}
   0x8   :  { %s111_s21 = scalar_lea.vmem %s16_s13, 256  ;;  %p116_p4 = scmp.lt.s32.totalorder %s16_s13, %s16_s13 }
   0x9   :  { %p112_p3 = scmp.ne.s32.totalorder %s16_s13, %s111_s21  ;;  %p117_p5 = scmp.lt.s32.totalorder %s111_s21, %s111_s21 }
   0xb   :  { %p118_p6 = por %p117_p5, %p116_p4 }
   0xd   :  { %p119_p7 = pnand %p118_p6, %p112_p3 }
   0xf   :  { %122 = shalt.err (!%p119_p7)
}
  0x10   :  { %s150_s22 = smov 128   ;;  %s151_s23 = smov 8  }
  0x11   :  { %21 = dma.hbm_to_vmem [thread:$0]  %s209_s0, 256, %s16_s13, [#allocation3], %s150_s22, %s150_s22, %s151_s23  }
  0x12   :  { %145 = dma.done.wait [#allocation3], 256  }
  0x13   :  { %146 = vsyncadd [#allocation3], 4294967040  ;;  %v29_v0 = vld [vmem:[#allocation2] sm:$0xff]  ;;  %v30_v1 = vld [vmem:[#allocation2 + $0x8] sm:$0xff]  ;;  %s152_s29 = smov [#allocation5]  }
  0x14   :  { %31 = vadd.xlane.f32.xlu0 %v29_v0  ;;  %v91_v17 = vld [vmem:[%s210_s1] ss:$0 sm:$0xff]  ;;  %s79_s30 = sshll.u32 %s152_s29, 4  ;;  %s80_s30 = int_to_ptr.vmem [resolvable:$true] %s79_s30 }
  0x15   :  { %v92_v19 = vld [vmem:[%s211_s2] ss:$0 sm:$0xff]  ;;  %s123_s4 = scalar_lea.vmem %s80_s30, 256  ;;  %p128_p9 = scmp.lt.s32.totalorder %s80_s30, %s80_s30 }
  0x16   :  { %p124_p8 = scmp.ne.s32.totalorder %s80_s30, %s123_s4  ;;  %p129_p10 = scmp.lt.s32.totalorder %s123_s4, %s123_s4 }
  0x18   :  { %33 = vadd.xlane.f32.xlu0 %v30_v1  ;;  %p130_p11 = por %p129_p10, %p128_p9 }
  0x1a   :  { %p131_p12 = pnand %p130_p11, %p124_p8 }
  0xa1   :  { %v32_v2 = vpop.xlane.xlu0 %31 }
  0xa2   :  { %v36_v3 = vmul.f32 0.0078125, %v32_v2 }
  0xa4   :  { %v38_v4 = vsub.f32 %v29_v0, %v36_v3 }
  0xa5   :  { %v34_v5 = vpop.xlane.xlu0 %33 }
  0xa6   :  { %v37_v6 = vmul.f32 0.0078125, %v34_v5  ;;  %v40_v7 = vmul.f32 %v38_v4, %v38_v4 }
  0xa8   :  { %v39_v8 = vsub.f32 %v30_v1, %v37_v6  ;;  %42 = vadd.xlane.f32.xlu1 %v40_v7 }
  0xaa   :  { %v41_v9 = vmul.f32 %v39_v8, %v39_v8 }
  0xac   :  { %44 = vadd.xlane.f32.xlu1 %v41_v9 }
 0x135   :  { %v43_v10 = vpop.xlane.xlu1 %42 }
 0x136   :  { %v46_v11 = vmul.f32 0.0078125, %v43_v10 }
 0x138   :  { %v48_v12 = vadd.f32 1e-05, %v46_v11 }
 0x139   :  { %v45_v13 = vpop.xlane.xlu1 %44 }
 0x13a   :  { %97 = vrsqrt.f32 %v48_v12  ;;  %v47_v14 = vmul.f32 0.0078125, %v45_v13 }
 0x13c   :  { %v49_v15 = vadd.f32 1e-05, %v47_v14 }
 0x13e   :  { %99 = vrsqrt.f32 %v49_v15 }
 0x144   :  { %v98_v16 = vpop.eup %97 }
 0x145   :  { %v54_v18 = vmul.f32 %v98_v16, %v38_v4 }
 0x147   :  { %v62_v20 = vmul.f32 %v91_v17, %v54_v18 }
 0x148   :  { %v100_v21 = vpop.eup %99 }
 0x149   :  { %v55_v22 = vmul.f32 %v100_v21, %v39_v8  ;;  %v70_v23 = vadd.f32 %v92_v19, %v62_v20 }
 0x14b   :  { %v63_v24 = vmul.f32 %v91_v17, %v55_v22  ;;  %72 = vst [vmem:[#allocation5] sm:$0xff] %v70_v23 }
 0x14d   :  { %v71_v25 = vadd.f32 %v92_v19, %v63_v24 }
 0x14f   :  { %73 = vst [vmem:[#allocation5 + $0x8] sm:$0xff] %v71_v25 }
 0x150   :  { %134 = shalt.err (!%p131_p12)
}
 0x151   :  { %s135_s5 = scalar_lea.hbm %s212_s3, 256 }
 0x152   :  { %p136_p13 = scmp.ne.s32.totalorder %s212_s3, %s135_s5  ;;  %p139_p0 = scmp.lt.u32.totalorder %s135_s5, %s212_s3 }
 0x154   :  { %p141_p1 = pnand %p139_p0, %p136_p13 }
 0x156   :  { %144 = shalt.err (!%p141_p1)
}
 0x157   :  { %85 = dma.vmem_to_hbm [thread:$0]  %s80_s30, 256, %s212_s3, [#allocation4], %s150_s22, %s150_s22, %s151_s23  }
 0x158   :  { %147 = dma.done.wait [#allocation4], 256  }
 0x159   :  { %148 = vsyncadd [#allocation4], 4294967040 }
 0x15a   :  { %89 = vsyncpa [#allocation3], 1 }
 0x15b   :  { %90 = vsyncpa [#allocation4], 1 }

</bundles_post_ra>
